<compile_context>
chip_gen: v7x
topology: tpu7x:2x2x1
jax: 0.10.0
libtpu: 0.0.40
codegen_flags: <defaults>
</compile_context>

<pallas_src>
import functools

import jax
import jax.numpy as jnp
from jax import lax
from jax.experimental import pallas as pl
from jax.experimental.pallas import tpu as pltpu

# Keep both the kernel's MXU matmuls and the pure-JAX reference in full f32 so
# the exact-equality argmax tie-break and the tolerance checks are meaningful.
jax.config.update("jax_default_matmul_precision", "highest")


# ----------------------------------------------------------------------------
# Fused eval-forward kernel (gridless, whole problem resident in VMEM).
# ----------------------------------------------------------------------------
def _memory_eval_kernel(x_ref, wcat_ref, wrow_ref, keys_ref, b_ref,
                        emb_ref, out_ref, *, m, T, inv_d):
    # x_ref:    (R, Cin)    flattened ref_nor rows (r = b*T + t)
    # wcat_ref: (3*Cin, D)  conv taps stacked on the contraction axis
    # wrow_ref: (2, D)      row 0 = conv bias, row 1 = cls_mem_w memory half
    # keys_ref: (2m+2, D)   [nor_keys; abn_keys; cls_w; cls_mem_w feat half]
    # b_ref:    (2,) SMEM   [cls_b, cls_mem_b]
    # emb_ref:  (R, D)      output: embedded ref_nor
    # out_ref:  (R, 4)      output: [p_score, updated_p_score, nor_comp, abn_comp]
    f32 = jnp.float32
    x = x_ref[...]                                                 # (R, Cin)
    R = x.shape[0]

    # --- Conv1d(k=3, stride=1, pad=1) taps via XLU sublane rolls ------------
    # roll(+1) -> row r holds x[r-1]; roll(R-1) (== -1) -> row r holds x[r+1].
    # Batch-boundary rows are zeroed, matching zero padding=1 per sequence.
    row = lax.broadcasted_iota(jnp.int32, x.shape, 0)
    t_in = row % T
    xp = jnp.where(t_in != 0,     pltpu.roll(x, 1,     axis=0), 0.0)
    xn = jnp.where(t_in != T - 1, pltpu.roll(x, R - 1, axis=0), 0.0)

    # --- one MXU matmul for all three taps (K = 3*Cin) + bias + ReLU --------
    xcat = jnp.concatenate([xp, x, xn], axis=1)                    # (R, 3*Cin)
    h = jnp.dot(xcat, wcat_ref[...], preferred_element_type=f32) + wrow_ref[0:1, :]
    feat = jnp.maximum(h, 0.0)                                     # (R, D)
    emb_ref[...] = feat

    # --- single shared score matmul against extended keys (no transpose) ----
    keys = keys_ref[...]                                           # (2m+2, D)
    score = lax.dot_general(feat, keys, (((1,), (1,)), ((), ())),
                            preferred_element_type=f32)            # (R, 2m+2)
    total = 2 * m
    col = lax.broadcasted_iota(jnp.int32, score.shape, 1)
    key_mask = col < total                                         # real memory keys
    neg_inf = jnp.float32(-jnp.inf)

    # --- p_classifier: logit is the extra cls_w column of the score ---------
    p_sig = jax.nn.sigmoid(score[:, total:total + 1] + b_ref[0])   # (R, 1)

    # --- memory read: softmax over the 2m key columns only ------------------
    s_mem = jnp.where(key_mask, score, neg_inf)
    smax = jnp.max(s_mem, axis=1, keepdims=True)
    e = jnp.exp(s_mem - smax)                                      # extras -> 0
    denom = jnp.sum(e, axis=1, keepdims=True)
    r = pl.reciprocal(denom, approx=True)
    r = r * (2.0 - denom * r)                                      # one Newton step
    p = e * r                                                      # (R, 2m+2), extras 0
    concat_mem = jnp.dot(p, keys, preferred_element_type=f32)      # (R, D)

    # --- p_classifier_mem on [feat, concat_mem] without materializing concat -
    u_logit = (score[:, total + 1:total + 2]                       # feat . wm_feat
               + jnp.sum(concat_mem * wrow_ref[1:2, :], axis=1, keepdims=True)
               + b_ref[1])
    u_sig = jax.nn.sigmoid(u_logit)                                # (R, 1)

    # --- eval gather_loss (compactness): direct MSE vs. nearest key ---------
    def compact(lo, hi):
        rng = (col >= lo) & (col < hi)
        s_m = jnp.where(rng, score, neg_inf)
        smx = jnp.max(s_m, axis=1, keepdims=True)
        # first-max index (matches torch.topk / argmax tie-break) in exact f32
        first = jnp.min(jnp.where(rng & (s_m == smx), col, total),
                        axis=1, keepdims=True)
        onehot = (col == first).astype(f32)                        # (R, 2m+2)
        k_star = jnp.dot(onehot, keys, preferred_element_type=f32)  # (R, D)
        d = feat - k_star
        return jnp.sum(d * d, axis=1, keepdims=True) * inv_d       # (R, 1)

    comp_nor = compact(0, m)
    comp_abn = compact(m, total)

    # --- single coalesced store of all per-row scalars -----------------------
    out_ref[...] = jnp.concatenate([p_sig, u_sig, comp_nor, comp_abn], axis=1)


# ----------------------------------------------------------------------------
# Forward (isTrain=False path of Memory.forward) — one fused pallas_call,
# with all constant preprocessing fused under the same jit.
# ----------------------------------------------------------------------------
@jax.jit
def memory_forward_eval(params, ref_nor, ref_abn, nor_keys, abn_keys):
    del ref_abn  # the abnormal branch is dead code for the eval-path outputs
    B, T, Cin = ref_nor.shape
    D = params["conv_w"].shape[-1]
    m = nor_keys.shape[0]
    R = B * T

    x_flat = ref_nor.reshape(R, Cin).astype(jnp.float32)
    wcat = params["conv_w"].reshape(3 * Cin, D)                    # taps on K axis

    cls_w_row = params["cls_w"].reshape(1, D)
    wm = params["cls_mem_w"].reshape(2 * D)
    wm_feat = wm[:D].reshape(1, D)
    wm_mem = wm[D:].reshape(1, D)
    # Extended keys: memory keys + the two D->1 classifier weight rows, so their
    # logits come out of the single shared score matmul (MXU has huge slack).
    keys_ext = jnp.concatenate([nor_keys, abn_keys, cls_w_row, wm_feat], axis=0)
    wrow = jnp.concatenate([params["conv_b"].reshape(1, D), wm_mem], axis=0)
    biases = jnp.stack([params["cls_b"].reshape(()),
                        params["cls_mem_b"].reshape(())])          # (2,)

    vmem = pl.BlockSpec(memory_space=pltpu.MemorySpace.VMEM)
    smem = pl.BlockSpec(memory_space=pltpu.MemorySpace.SMEM)

    emb, packed = pl.pallas_call(
        functools.partial(_memory_eval_kernel, m=m, T=T, inv_d=1.0 / D),
        out_shape=(jax.ShapeDtypeStruct((R, D), jnp.float32),
                   jax.ShapeDtypeStruct((R, 4), jnp.float32)),
        in_specs=[vmem, vmem, vmem, vmem, smem],
        out_specs=(vmem, vmem),
    )(x_flat, wcat, wrow, keys_ext, biases)

    p_score_nor = packed[:, 0].reshape(B, T)
    updated_p_score = packed[:, 1].reshape(B, T)
    nor_comp = packed[:, 2]                                        # (B*T,)
    abn_comp = packed[:, 3]                                        # (B*T,)
    ref_nor_e = emb.reshape(B, T, D)
    return p_score_nor, updated_p_score, nor_comp, abn_comp, ref_nor_e


# ----------------------------------------------------------------------------
# Pure-JAX reference (mirrors the PyTorch eval semantics) for the sanity check.
# ----------------------------------------------------------------------------
def memory_forward_ref(params, ref_nor, ref_abn, nor_keys, abn_keys):
    bs, T, _ = ref_nor.shape
    D = params["conv_w"].shape[-1]

    def emb(x):
        xp = jnp.pad(x, ((0, 0), (1, 1), (0, 0)))
        y = (xp[:, 0:T] @ params["conv_w"][0]
             + xp[:, 1:T + 1] @ params["conv_w"][1]
             + xp[:, 2:T + 2] @ params["conv_w"][2]) + params["conv_b"][0]
        return jnp.maximum(y, 0.0)

    ref = emb(jnp.concatenate([ref_nor, ref_abn], axis=0))
    ref_nor_e = ref[:bs]
    p_score = jax.nn.sigmoid(ref @ params["cls_w"] + params["cls_b"][0, 0])[:, :, 0]
    p_score_nor = p_score[:bs]

    keys = jnp.concatenate([nor_keys, abn_keys], axis=0)
    feat_flat = ref_nor_e.reshape(bs * T, D)
    score = feat_flat @ keys.T
    p = jax.nn.softmax(score, axis=1)
    concat_mem = p @ keys
    updated_feat = jnp.concatenate([feat_flat, concat_mem], axis=1)
    updated_p_score = jax.nn.sigmoid(
        updated_feat @ params["cls_mem_w"] + params["cls_mem_b"][0, 0]).reshape(bs, T)

    def comp(keys_):
        s = feat_flat @ keys_.T
        idx = jnp.argmax(s, axis=1)
        return jnp.mean((feat_flat - keys_[idx]) ** 2, axis=1)

    return p_score_nor, updated_p_score, comp(nor_keys), comp(abn_keys), ref_nor_e


if __name__ == "__main__":
    # Small shapes consistent with the module: feature_dim=16, out_feature_dim=32,
    # batch=2 (per branch), seq=8, memory slots=6 per branch.
    B, T, C_IN, D, M = 2, 8, 16, 32, 6

    key = jax.random.PRNGKey(0)
    ks = jax.random.split(key, 10)

    params = {
        "conv_w": 0.2 * jax.random.normal(ks[0], (3, C_IN, D), jnp.float32),
        "conv_b": 0.1 * jax.random.normal(ks[1], (1, D), jnp.float32),
        "cls_w": 0.2 * jax.random.normal(ks[2], (D, 1), jnp.float32),
        "cls_b": 0.1 * jax.random.normal(ks[3], (1, 1), jnp.float32),
        "cls_mem_w": 0.2 * jax.random.normal(ks[4], (2 * D, 1), jnp.float32),
        "cls_mem_b": 0.1 * jax.random.normal(ks[5], (1, 1), jnp.float32),
    }

    ref_nor = jax.random.normal(ks[6], (B, T, C_IN), jnp.float32)
    ref_abn = jax.random.normal(ks[7], (B, T, C_IN), jnp.float32)
    nor_keys = jax.random.normal(ks[8], (M, D), jnp.float32)
    abn_keys = jax.random.normal(ks[9], (M, D), jnp.float32)

    outs = memory_forward_eval(params, ref_nor, ref_abn, nor_keys, abn_keys)
    outs = jax.block_until_ready(outs)

    refs = memory_forward_ref(params, ref_nor, ref_abn, nor_keys, abn_keys)
    tols = [
        (1e-4, 1e-5),   # p_score_nor
        (1e-3, 1e-3),   # updated_p_score (Newton-refined approx reciprocal)
        (3e-4, 3e-4),   # nor compactness
        (3e-4, 3e-4),   # abn compactness
        (1e-4, 1e-5),   # embedded ref_nor
    ]
    for o, r, (rt, at) in zip(outs, refs, tols):
        assert o.shape == r.shape, (o.shape, r.shape)
        assert jnp.allclose(o, r, rtol=rt, atol=at), float(jnp.max(jnp.abs(o - r)))

    print("KERNEL_OK")
</pallas_src>

<mosaic_0001>
module attributes {stable_mosaic.version = 11 : i64} {
  func.func @_memory_eval_kernel(%arg0: memref<16x16xf32, #tpu.memory_space<vmem>>, %arg1: memref<48x32xf32, #tpu.memory_space<vmem>>, %arg2: memref<2x32xf32, #tpu.memory_space<vmem>>, %arg3: memref<14x32xf32, #tpu.memory_space<vmem>>, %arg4: memref<2xf32, #tpu.memory_space<smem>>, %arg5: memref<16x32xf32, #tpu.memory_space<vmem>>, %arg6: memref<16x4xf32, #tpu.memory_space<vmem>>) attributes {dimension_semantics = [], scalar_prefetch = 0 : i64, scratch_operands = 0 : i64, tpu.core_type = #tpu.core_type<tc>} {
    %c0 = arith.constant 0 : index
    %c0_0 = arith.constant 0 : index
    %0 = vector.load %arg0[%c0, %c0_0] : memref<16x16xf32, #tpu.memory_space<vmem>>, vector<16x16xf32>
    %1 = tpu.iota {dimensions = array<i32: 0>} : vector<16x16xi32>
    %c8_i32 = arith.constant 8 : i32
    %c0_i32 = arith.constant 0 : i32
    %2 = arith.cmpi eq, %c8_i32, %c0_i32 : i32
    %c1_i32 = arith.constant 1 : i32
    %3 = arith.select %2, %c1_i32, %c8_i32 : i32
    %4 = vector.broadcast %3 : i32 to vector<16x16xi32>
    %5 = arith.remsi %1, %4 : vector<16x16xi32>
    %c0_i32_1 = arith.constant 0 : i32
    %6 = vector.broadcast %c0_i32_1 : i32 to vector<16x16xi32>
    %7 = arith.cmpi ne, %5, %6 : vector<16x16xi32>
    %c0_i32_2 = arith.constant 0 : i32
    %8 = vector.broadcast %c0_i32_2 : i32 to vector<16x16xi32>
    %9 = arith.cmpi slt, %5, %8 : vector<16x16xi32>
    %c0_i32_3 = arith.constant 0 : i32
    %10 = arith.cmpi slt, %3, %c0_i32_3 : i32
    %11 = vector.broadcast %10 : i1 to vector<16x16xi1>
    %12 = vector.broadcast %11 : vector<16x16xi1> to vector<16x16xi1>
    %13 = arith.xori %9, %12 : vector<16x16xi1>
    %14 = arith.andi %13, %7 : vector<16x16xi1>
    %15 = vector.broadcast %3 : i32 to vector<16x16xi32>
    %16 = arith.addi %5, %15 : vector<16x16xi32>
    %17 = arith.select %14, %16, %5 : vector<16x16xi1>, vector<16x16xi32>
    %c0_i32_4 = arith.constant 0 : i32
    %18 = vector.broadcast %c0_i32_4 : i32 to vector<16x16xi32>
    %19 = arith.cmpi ne, %17, %18 : vector<16x16xi32>
    %c1_i32_5 = arith.constant 1 : i32
    %20 = tpu.dynamic_rotate %0 by %c1_i32_5 dim 0 : vector<16x16xf32>, i32 -> vector<16x16xf32>
    %cst = arith.constant 0.000000e+00 : f32
    %21 = vector.broadcast %cst : f32 to vector<16x16xf32>
    %22 = arith.select %19, %20, %21 : vector<16x16xi1>, vector<16x16xf32>
    %c7_i32 = arith.constant 7 : i32
    %23 = vector.broadcast %c7_i32 : i32 to vector<16x16xi32>
    %24 = arith.cmpi ne, %17, %23 : vector<16x16xi32>
    %c15_i32 = arith.constant 15 : i32
    %25 = tpu.dynamic_rotate %0 by %c15_i32 dim 0 : vector<16x16xf32>, i32 -> vector<16x16xf32>
    %cst_6 = arith.constant 0.000000e+00 : f32
    %26 = vector.broadcast %cst_6 : f32 to vector<16x16xf32>
    %27 = arith.select %24, %25, %26 : vector<16x16xi1>, vector<16x16xf32>
    %28 = tpu.concatenate %22, %0, %27 in 1 : vector<16x16xf32>, vector<16x16xf32>, vector<16x16xf32> -> vector<16x48xf32>
    %c0_7 = arith.constant 0 : index
    %c0_8 = arith.constant 0 : index
    %29 = vector.load %arg1[%c0_7, %c0_8] : memref<48x32xf32, #tpu.memory_space<vmem>>, vector<48x32xf32>
    %cst_9 = arith.constant dense<0.000000e+00> : vector<16x32xf32>
    %30 = tpu.matmul %28, %29, %cst_9 {dimension_numbers = #tpu.dot_dimension_numbers<[1], [0], [0], [1], [0, 0, 1, 1], [], []>, precision = #tpu.contract_precision<fp32>} : vector<16x48xf32>, vector<48x32xf32>, vector<16x32xf32> -> vector<16x32xf32>
    %c0_10 = arith.constant 0 : index
    %c0_11 = arith.constant 0 : index
    %31 = vector.load %arg2[%c0_10, %c0_11] : memref<2x32xf32, #tpu.memory_space<vmem>>, vector<1x32xf32>
    %32 = vector.broadcast %31 : vector<1x32xf32> to vector<16x32xf32>
    %33 = arith.addf %30, %32 : vector<16x32xf32>
    %cst_12 = arith.constant 0.000000e+00 : f32
    %34 = vector.broadcast %cst_12 : f32 to vector<16x32xf32>
    %35 = arith.maximumf %33, %34 : vector<16x32xf32>
    %c0_13 = arith.constant 0 : index
    %c0_14 = arith.constant 0 : index
    %36 = vector.load %arg5[%c0_13, %c0_14] : memref<16x32xf32, #tpu.memory_space<vmem>>, vector<16x32xf32>
    tpu.vector_store %arg5[%c0_13, %c0_14], %35 {strides = array<i32>} : memref<16x32xf32, #tpu.memory_space<vmem>>, vector<16x32xf32>,
    %c0_15 = arith.constant 0 : index
    %c0_16 = arith.constant 0 : index
    %37 = vector.load %arg3[%c0_15, %c0_16] : memref<14x32xf32, #tpu.memory_space<vmem>>, vector<14x32xf32>
    %cst_17 = arith.constant dense<0.000000e+00> : vector<16x14xf32>
    %38 = tpu.matmul %35, %37, %cst_17 {dimension_numbers = #tpu.dot_dimension_numbers<[1], [1], [0], [0], [0, 0, 1, 0], [], []>, precision = #tpu.contract_precision<fp32>} : vector<16x32xf32>, vector<14x32xf32>, vector<16x14xf32> -> vector<16x14xf32>
    %39 = tpu.iota {dimensions = array<i32: 1>} : vector<16x14xi32>
    %c12_i32 = arith.constant 12 : i32
    %40 = vector.broadcast %c12_i32 : i32 to vector<16x14xi32>
    %41 = arith.cmpi slt, %39, %40 : vector<16x14xi32>
    %42 = vector.extract_strided_slice %38 {offsets = [0, 12], sizes = [16, 1], strides = [1, 1]} : vector<16x14xf32> to vector<16x1xf32>
    %c0_18 = arith.constant 0 : index
    %43 = memref.load %arg4[%c0_18] : memref<2xf32, #tpu.memory_space<smem>>
    %44 = vector.broadcast %43 : f32 to vector<16x1xf32>
    %45 = arith.addf %42, %44 : vector<16x1xf32>
    %46 = arith.negf %45 : vector<16x1xf32>
    %47 = math.exp %46 : vector<16x1xf32>
    %cst_19 = arith.constant 1.000000e+00 : f32
    %48 = vector.broadcast %cst_19 : f32 to vector<16x1xf32>
    %49 = arith.addf %48, %47 : vector<16x1xf32>
    %50 = arith.divf %48, %49 : vector<16x1xf32>
    %cst_20 = arith.constant 0xFF800000 : f32
    %51 = vector.broadcast %cst_20 : f32 to vector<16x14xf32>
    %52 = arith.select %41, %38, %51 : vector<16x14xi1>, vector<16x14xf32>
    %cst_21 = arith.constant dense<0xFF800000> : vector<16xf32>
    %53 = vector.multi_reduction <maximumf>, %52, %cst_21 [1] : vector<16x14xf32> to vector<16xf32>
    %54 = vector.shape_cast %53 : vector<16xf32> to vector<16x1xf32>
    %55 = vector.broadcast %54 : vector<16x1xf32> to vector<16x14xf32>
    %56 = arith.subf %52, %55 : vector<16x14xf32>
    %57 = math.exp %56 : vector<16x14xf32>
    %cst_22 = arith.constant dense<0.000000e+00> : vector<16xf32>
    %58 = vector.multi_reduction <add>, %57, %cst_22 [1] : vector<16x14xf32> to vector<16xf32>
    %59 = vector.shape_cast %58 : vector<16xf32> to vector<16x1xf32>
    %60 = tpu.reciprocal %59 {approx = true} : vector<16x1xf32> -> vector<16x1xf32>
    %61 = arith.mulf %59, %60 : vector<16x1xf32>
    %cst_23 = arith.constant 2.000000e+00 : f32
    %62 = vector.broadcast %cst_23 : f32 to vector<16x1xf32>
    %63 = arith.subf %62, %61 : vector<16x1xf32>
    %64 = arith.mulf %60, %63 : vector<16x1xf32>
    %65 = vector.broadcast %64 : vector<16x1xf32> to vector<16x14xf32>
    %66 = arith.mulf %57, %65 : vector<16x14xf32>
    %cst_24 = arith.constant dense<0.000000e+00> : vector<16x32xf32>
    %67 = tpu.matmul %66, %37, %cst_24 {dimension_numbers = #tpu.dot_dimension_numbers<[1], [0], [0], [1], [0, 0, 1, 1], [], []>, precision = #tpu.contract_precision<fp32>} : vector<16x14xf32>, vector<14x32xf32>, vector<16x32xf32> -> vector<16x32xf32>
    %68 = vector.extract_strided_slice %38 {offsets = [0, 13], sizes = [16, 1], strides = [1, 1]} : vector<16x14xf32> to vector<16x1xf32>
    %c1 = arith.constant 1 : index
    %c0_25 = arith.constant 0 : index
    %69 = vector.load %arg2[%c1, %c0_25] : memref<2x32xf32, #tpu.memory_space<vmem>>, vector<1x32xf32>
    %70 = vector.broadcast %69 : vector<1x32xf32> to vector<16x32xf32>
    %71 = arith.mulf %67, %70 : vector<16x32xf32>
    %cst_26 = arith.constant dense<0.000000e+00> : vector<16xf32>
    %72 = vector.multi_reduction <add>, %71, %cst_26 [1] : vector<16x32xf32> to vector<16xf32>
    %73 = vector.shape_cast %72 : vector<16xf32> to vector<16x1xf32>
    %74 = arith.addf %68, %73 : vector<16x1xf32>
    %c1_27 = arith.constant 1 : index
    %75 = memref.load %arg4[%c1_27] : memref<2xf32, #tpu.memory_space<smem>>
    %76 = vector.broadcast %75 : f32 to vector<16x1xf32>
    %77 = arith.addf %74, %76 : vector<16x1xf32>
    %78 = arith.negf %77 : vector<16x1xf32>
    %79 = math.exp %78 : vector<16x1xf32>
    %cst_28 = arith.constant 1.000000e+00 : f32
    %80 = vector.broadcast %cst_28 : f32 to vector<16x1xf32>
    %81 = arith.addf %80, %79 : vector<16x1xf32>
    %82 = arith.divf %80, %81 : vector<16x1xf32>
    %c0_i32_29 = arith.constant 0 : i32
    %83 = vector.broadcast %c0_i32_29 : i32 to vector<16x14xi32>
    %84 = arith.cmpi sge, %39, %83 : vector<16x14xi32>
    %c6_i32 = arith.constant 6 : i32
    %85 = vector.broadcast %c6_i32 : i32 to vector<16x14xi32>
    %86 = arith.cmpi slt, %39, %85 : vector<16x14xi32>
    %87 = arith.andi %84, %86 : vector<16x14xi1>
    %cst_30 = arith.constant 0xFF800000 : f32
    %88 = vector.broadcast %cst_30 : f32 to vector<16x14xf32>
    %89 = arith.select %87, %38, %88 : vector<16x14xi1>, vector<16x14xf32>
    %cst_31 = arith.constant dense<0xFF800000> : vector<16xf32>
    %90 = vector.multi_reduction <maximumf>, %89, %cst_31 [1] : vector<16x14xf32> to vector<16xf32>
    %91 = vector.shape_cast %90 : vector<16xf32> to vector<16x1xf32>
    %92 = vector.broadcast %91 : vector<16x1xf32> to vector<16x14xf32>
    %93 = arith.cmpf oeq, %89, %92 : vector<16x14xf32>
    %94 = arith.andi %87, %93 : vector<16x14xi1>
    %c12_i32_32 = arith.constant 12 : i32
    %95 = vector.broadcast %c12_i32_32 : i32 to vector<16x14xi32>
    %96 = arith.select %94, %39, %95 : vector<16x14xi1>, vector<16x14xi32>
    %cst_33 = arith.constant dense<2147483647> : vector<16xi32>
    %97 = vector.multi_reduction <minsi>, %96, %cst_33 [1] : vector<16x14xi32> to vector<16xi32>
    %98 = vector.shape_cast %97 : vector<16xi32> to vector<16x1xi32>
    %99 = vector.broadcast %98 : vector<16x1xi32> to vector<16x14xi32>
    %100 = arith.cmpi eq, %39, %99 : vector<16x14xi32>
    %101 = arith.extui %100 : vector<16x14xi1> to vector<16x14xi32>
    %102 = arith.sitofp %101 : vector<16x14xi32> to vector<16x14xf32>
    %cst_34 = arith.constant dense<0.000000e+00> : vector<16x32xf32>
    %103 = tpu.matmul %102, %37, %cst_34 {dimension_numbers = #tpu.dot_dimension_numbers<[1], [0], [0], [1], [0, 0, 1, 1], [], []>, precision = #tpu.contract_precision<fp32>} : vector<16x14xf32>, vector<14x32xf32>, vector<16x32xf32> -> vector<16x32xf32>
    %104 = arith.subf %35, %103 : vector<16x32xf32>
    %105 = arith.mulf %104, %104 : vector<16x32xf32>
    %cst_35 = arith.constant dense<0.000000e+00> : vector<16xf32>
    %106 = vector.multi_reduction <add>, %105, %cst_35 [1] : vector<16x32xf32> to vector<16xf32>
    %107 = vector.shape_cast %106 : vector<16xf32> to vector<16x1xf32>
    %cst_36 = arith.constant 3.125000e-02 : f32
    %108 = vector.broadcast %cst_36 : f32 to vector<16x1xf32>
    %109 = arith.mulf %107, %108 : vector<16x1xf32>
    %c6_i32_37 = arith.constant 6 : i32
    %110 = vector.broadcast %c6_i32_37 : i32 to vector<16x14xi32>
    %111 = arith.cmpi sge, %39, %110 : vector<16x14xi32>
    %c12_i32_38 = arith.constant 12 : i32
    %112 = vector.broadcast %c12_i32_38 : i32 to vector<16x14xi32>
    %113 = arith.cmpi slt, %39, %112 : vector<16x14xi32>
    %114 = arith.andi %111, %113 : vector<16x14xi1>
    %cst_39 = arith.constant 0xFF800000 : f32
    %115 = vector.broadcast %cst_39 : f32 to vector<16x14xf32>
    %116 = arith.select %114, %38, %115 : vector<16x14xi1>, vector<16x14xf32>
    %cst_40 = arith.constant dense<0xFF800000> : vector<16xf32>
    %117 = vector.multi_reduction <maximumf>, %116, %cst_40 [1] : vector<16x14xf32> to vector<16xf32>
    %118 = vector.shape_cast %117 : vector<16xf32> to vector<16x1xf32>
    %119 = vector.broadcast %118 : vector<16x1xf32> to vector<16x14xf32>
    %120 = arith.cmpf oeq, %116, %119 : vector<16x14xf32>
    %121 = arith.andi %114, %120 : vector<16x14xi1>
    %c12_i32_41 = arith.constant 12 : i32
    %122 = vector.broadcast %c12_i32_41 : i32 to vector<16x14xi32>
    %123 = arith.select %121, %39, %122 : vector<16x14xi1>, vector<16x14xi32>
    %cst_42 = arith.constant dense<2147483647> : vector<16xi32>
    %124 = vector.multi_reduction <minsi>, %123, %cst_42 [1] : vector<16x14xi32> to vector<16xi32>
    %125 = vector.shape_cast %124 : vector<16xi32> to vector<16x1xi32>
    %126 = vector.broadcast %125 : vector<16x1xi32> to vector<16x14xi32>
    %127 = arith.cmpi eq, %39, %126 : vector<16x14xi32>
    %128 = arith.extui %127 : vector<16x14xi1> to vector<16x14xi32>
    %129 = arith.sitofp %128 : vector<16x14xi32> to vector<16x14xf32>
    %cst_43 = arith.constant dense<0.000000e+00> : vector<16x32xf32>
    %130 = tpu.matmul %129, %37, %cst_43 {dimension_numbers = #tpu.dot_dimension_numbers<[1], [0], [0], [1], [0, 0, 1, 1], [], []>, precision = #tpu.contract_precision<fp32>} : vector<16x14xf32>, vector<14x32xf32>, vector<16x32xf32> -> vector<16x32xf32>
    %131 = arith.subf %35, %130 : vector<16x32xf32>
    %132 = arith.mulf %131, %131 : vector<16x32xf32>
    %cst_44 = arith.constant dense<0.000000e+00> : vector<16xf32>
    %133 = vector.multi_reduction <add>, %132, %cst_44 [1] : vector<16x32xf32> to vector<16xf32>
    %134 = vector.shape_cast %133 : vector<16xf32> to vector<16x1xf32>
    %cst_45 = arith.constant 3.125000e-02 : f32
    %135 = vector.broadcast %cst_45 : f32 to vector<16x1xf32>
    %136 = arith.mulf %134, %135 : vector<16x1xf32>
    %137 = tpu.concatenate %50, %82, %109, %136 in 1 : vector<16x1xf32>, vector<16x1xf32>, vector<16x1xf32>, vector<16x1xf32> -> vector<16x4xf32>
    %c0_46 = arith.constant 0 : index
    %c0_47 = arith.constant 0 : index
    %138 = vector.load %arg6[%c0_46, %c0_47] : memref<16x4xf32, #tpu.memory_space<vmem>>, vector<16x4xf32>
    tpu.vector_store %arg6[%c0_46, %c0_47], %137 {strides = array<i32>} : memref<16x4xf32, #tpu.memory_space<vmem>>, vector<16x4xf32>,
    return
  }
}

</mosaic_0001>

<bundles_post_ra>
// kernel: squeeze.5
= control target key start
LH: loop header
LB: loop body
LE: loop exit
PB: predicated region body
PF: predicated region fallthrough
CT: control target
= control target key end

     0   :  { %s85_s0 = inlined_call_operand.vmem [shape: f32[16], index: 0, kind: input, shape index: {}]   ;;  %s86_s1 = inlined_call_operand.hbm [shape: f32[2,8], index: 1, kind: output, shape index: {}]  }
   0x1   :  { %v5_v0 = vld [vmem:[%s85_s0] sm:$0x1] }
   0x2   :  { %2 = vsyncpa [#allocation1], 0  ;;  %6 = vst [vmem:[#allocation3] sm:$0x1] %v5_v0  ;;  %vm8_vm0 = vcmask 64512   ;;  %s58_s0 = smov 120  }
   0x3   :  { %s59_s8 = smov [#allocation0]  }
   0x4   :  { %s26_s9 = sshll.u32 %s59_s8, 4  ;;  %s27_s9 = int_to_ptr.vmem [resolvable:$true] %s26_s9 }
   0x5   :  { %s34_s10 = scalar_lea.vmem %s27_s9, 32  ;;  %p39_p1 = scmp.lt.s32.totalorder %s27_s9, %s27_s9 }
   0x6   :  { %p35_p0 = scmp.ne.s32.totalorder %s27_s9, %s34_s10  ;;  %p40_p2 = scmp.lt.s32.totalorder %s34_s10, %s34_s10 }
   0x8   :  { %p41_p3 = por %p40_p2, %p39_p1 }
   0x9   :  { %v10_v1 = vld [vmem:[#allocation3] sm:$0x1]  }
   0xa   :  { %v7_v2 = vld [vmem:[#allocation3] sm:$0x1]   ;;  %11 = vrot.lane.b32.xlu0 %v10_v1, %s58_s0  ;;  %p42_p4 = pnand %p41_p3, %p35_p0 }
   0xb   :  { %9 = vst.msk [vmem:[#allocation2] sm:$0x1] %vm8_vm0, %v7_v2  }
  0x7c   :  { %v12_v3 = vpop.permute.xlu0 %11  }
  0x7d   :  { %15 = vst.msk [vmem:[#allocation2 + $0x1] sm:$0x1] %vm8_vm0, %v12_v3  }
  0x84   :  { %v19_v4 = vld [vmem:[#allocation2] sm:$0x3] }
  0x85   :  { %21 = vst [vmem:[#allocation0] sm:$0x3] %v19_v4 }
  0x86   :  { %45 = shalt.err (!%p42_p4)
}
  0x87   :  { %s46_s13 = scalar_lea.hbm %s86_s1, 32 }
  0x88   :  { %p47_p5 = scmp.ne.s32.totalorder %s86_s1, %s46_s13  ;;  %p50_p6 = scmp.lt.u32.totalorder %s46_s13, %s86_s1 }
  0x8a   :  { %p52_p7 = pnand %p50_p6, %p47_p5 }
  0x8c   :  { %55 = shalt.err (!%p52_p7)
}
  0x8d   :  { %29 = dma.vmem_to_hbm [thread:$0]  %s27_s9, 32, %s86_s1, [#allocation1]  }
  0x8e   :  { %56 = dma.done.wait [#allocation1], 32  }
  0x8f   :  { %57 = vsyncadd [#allocation1], 4294967264 }
  0x90   :  { %31 = vsyncpa [#allocation1], 1 }

// kernel: memory_forward_eval.1
= control target key start
LH: loop header
LB: loop body
LE: loop exit
PB: predicated region body
PF: predicated region fallthrough
CT: control target
= control target key end

     0   :  { %12 = vsyncpa [#allocation4], 0  ;;  %s4059_s0 = inlined_call_operand.vmem [shape: f32[16,16], index: 0, kind: input, shape index: {}]   ;;  %s4060_s1 = inlined_call_operand.vmem [shape: f32[48,32], index: 1, kind: input, shape index: {}]   ;;  %s4061_s2 = inlined_call_operand.vmem [shape: f32[2,32], index: 2, kind: input, shape index: {}]   ;;  %s4062_s3 = inlined_call_operand.vmem [shape: f32[14,32], index: 3, kind: input, shape index: {}]   ;;  %s4063_s4 = inlined_call_operand.vmem [shape: f32[2], index: 4, kind: input, shape index: {}]   ;;  %s4064_s5 = inlined_call_operand.hbm [shape: f32[16,32], index: 5, kind: output, shape index: {0}]   ;;  %s4065_s6 = inlined_call_operand.vmem [shape: f32[16,4], index: 6, kind: output, shape index: {1}]  }
   0x1   :  { %13 = vsyncpa [#allocation3], 0  ;;  %s28_s23 = sshll.u32 %s4063_s4, 4  ;;  %s29_s23 = int_to_ptr.vmem [resolvable:$true] %s28_s23 }
   0x2   :  { %s3660_s24 = scalar_lea.vmem %s29_s23, 16  ;;  %p3665_p1 = scmp.lt.s32.totalorder %s29_s23, %s29_s23 }
   0x3   :  { %p3661_p0 = scmp.ne.s32.totalorder %s29_s23, %s3660_s24  ;;  %p3666_p2 = scmp.lt.s32.totalorder %s3660_s24, %s3660_s24 }
   0x5   :  { %p3667_p3 = por %p3666_p2, %p3665_p1 }
   0x7   :  { %p3668_p4 = pnand %p3667_p3, %p3661_p0 }
   0x9   :  { %3671 = shalt.err (!%p3668_p4)
}
   0xa   :  { %s3698_s25 = smov [#allocation2]  }
   0xb   :  { %31 = dma.vmem_to_smem %s29_s23, 16, %s3698_s25, [#allocation4]  }
   0xc   :  { %3694 = dma.done.wait [#allocation4], 16  }
   0xd   :  { %3695 = vsyncadd [#allocation4], 4294967280 }
   0xe   :  { %35 = sfence }
   0xf   :  { %v36_v0 = vld [vmem:[%s4059_s0] sm:$0xff]  ;;  %v37_v1 = vld [vmem:[%s4059_s0 + $0x8] sm:$0xff]  ;;  %v38_v2 = vlaneseq  ;;  %s3699_s4 = smov 16   ;;  %v107_v11 = vld [vmem:[%s4060_s1 + $0x10] sm:$0xff]  ;;  %s3700_s17 = smov 32   ;;  %vm99_vm6 = vcmask 130048  }
  0x10   :  { %85 = vrot.lane.b32.xlu0 %v36_v0, %s3699_s4  ;;  %v67_v3 = vrot.slane %v36_v0, 7  ;;  %v76_v4 = vrot.slane %v36_v0, 1  ;;  %v77_v5 = vrot.slane %v37_v1, 1  ;;  %v68_v6 = vrot.slane %v37_v1, 7  ;;  %v105_v7 = vld [vmem:[%s4060_s1] sm:$0xff]  ;;  %v106_v8 = vld [vmem:[%s4060_s1 + $0x8] sm:$0xff] }
  0x11   :  { %v39_v9 = vshrl.u32 %v38_v2, 7  ;;  %v124_v10 = vand.u32 4294901760, %v105_v7  ;;  %v108_v12 = vld [vmem:[%s4060_s1 + $0x18] sm:$0xff]  ;;  %v127_v13 = vand.u32 4294901760, %v106_v8  ;;  %v130_v14 = vand.u32 4294901760, %v107_v11  ;;  %v109_v18 = vld [vmem:[%s4060_s1 + $0x20] sm:$0xff] }
  0x12   :  { %v133_v15 = vand.u32 4294901760, %v108_v12  ;;  %v110_v23 = vld [vmem:[%s4060_s1 + $0x28] sm:$0xff]  ;;  %v136_v30 = vand.u32 4294901760, %v109_v18  ;;  %vm102_vm7 = vcmask 261120   ;;  %vm116_vm8 = vcmask 392192   ;;  %s3856_s22 = sld [smem:[#allocation2]] }
  0x13   :  { %v45_v16 = vand.u32 7, %v39_v9  ;;  %vm78_vm0 = vcmp.lt.s32.totalorder %v39_v9, 7  ;;  %v40_v17 = vadd.s32 8, %v39_v9  ;;  %vm69_vm1 = vcmp.lt.s32.totalorder %v39_v9, 1  ;;  %s3702_s25 = smov 116   ;;  %s3703_s26 = smov [#allocation5]  }
  0x14   :  { %v79_v19 = vsel %vm78_vm0, %v76_v4, %v77_v5  ;;  %87 = vrot.lane.b32.xlu0 %v37_v1, %s3699_s4  ;;  %v80_v20 = vsel %vm78_vm0, %v77_v5, %v76_v4  ;;  %v3766_v21 = vsel %vm69_vm1, %v68_v6, %v67_v3  ;;  %v3768_v22 = vsel %vm69_vm1, %v67_v3, %v68_v6  ;;  %s2967_s27 = sshll.u32 %s3703_s26, 4  ;;  %s2968_s27 = int_to_ptr.vmem [resolvable:$true] %s2967_s27 }
  0x15   :  { %vm74_vm2 = vcmp.ne.s32.totalorder %v45_v16, 7  ;;  %v52_v24 = vand.u32 7, %v40_v17  ;;  %vm3773_vm3 = vcmp.ne.s32.totalorder %v45_v16, 0  ;;  %v3777_v26 = vpack.c.bf16 %v127_v13, %v124_v10  ;;  %s3672_s28 = scalar_lea.vmem %s2968_s27, 256  ;;  %p3677_p6 = scmp.lt.s32.totalorder %s2968_s27, %s2968_s27 }
  0x16   :  { %v81_v27 = vsel %vm74_vm2, %v79_v19, 0.0  ;;  %v72_v28 = vsel %vm3773_vm3, %v3766_v21, 0.0  ;;  %v3782_v29 = vpack.c.bf16 %v133_v15, %v130_v14  ;;  %v139_v33 = vand.u32 4294901760, %v110_v23  ;;  %p3673_p5 = scmp.ne.s32.totalorder %s2968_s27, %s3672_s28  ;;  %p3678_p7 = scmp.lt.s32.totalorder %s3672_s28, %s3672_s28 }
  0x17   :  { %93 = vrot.lane.b32.xlu1 %v81_v27, %s3700_s17  ;;  %vm3784_vm4 = vcmp.ne.s32.totalorder %v52_v24, 7  ;;  %vm3788_vm5 = vcmp.ne.s32.totalorder %v52_v24, 0  ;;  %3409 = vmatprep.subr.bf16.mxu0 %v3777_v26  ;;  %v216_v34 = vsub.f32 %v105_v7, %v124_v10  ;;  %v223_v37 = vsub.f32 %v106_v8, %v127_v13 }
  0x18   :  { %v82_v35 = vsel %vm3784_vm4, %v80_v20, 0.0  ;;  %v73_v36 = vsel %vm3788_vm5, %v3768_v22, 0.0  ;;  %3411 = vmatpush3.bf16.msra.mxu0 %v3777_v26  ;;  %v230_v38 = vsub.f32 %v107_v11, %v130_v14  ;;  %v3800_v39 = vpack.c.bf16 %v139_v33, %v136_v30  ;;  %p3679_p8 = por %p3678_p7, %p3677_p6 }
  0x19   :  { %3413 = vmatprep.subr.bf16.mxu0 %v3782_v29  ;;  %v217_v40 = vand.u32 4294901760, %v216_v34  ;;  %v237_v41 = vsub.f32 %v108_v12, %v133_v15  ;;  %v244_v42 = vsub.f32 %v109_v18, %v136_v30  ;;  %v224_v43 = vand.u32 4294901760, %v223_v37  ;;  %v682_v30 = vld [vmem:[%s4062_s3 + $0x8] sm:$0x3f] }
  0x1a   :  { %v231_v44 = vand.u32 4294901760, %v230_v38  ;;  %v251_v45 = vsub.f32 %v110_v23, %v139_v33  ;;  %v3432_v0 = vpack.c.bf16 %v223_v37, %v216_v34  ;;  %v693_v31 = vsel %vm102_vm7, %v682_v30, 0  ;;  %p3680_p9 = pnand %p3679_p8, %p3673_p5 }
  0x1b   :  { %95 = vrot.lane.b32.xlu1 %v82_v35, %s3700_s17  ;;  %v218_v46 = vsub.f32 %v216_v34, %v217_v40  ;;  %v238_v47 = vand.u32 4294901760, %v237_v41  ;;  %v245_v48 = vand.u32 4294901760, %v244_v42  ;;  %v225_v49 = vsub.f32 %v223_v37, %v224_v43 }
  0x1c   :  { %3415 = vmatpush3.bf16.msra.mxu0 %v3782_v29  ;;  %v232_v50 = vsub.f32 %v230_v38, %v231_v44  ;;  %v252_v51 = vand.u32 4294901760, %v251_v45  ;;  %v3436_v1 = vpack.c.bf16 %v237_v41, %v230_v38  ;;  %v3440_v3 = vpack.c.bf16 %v251_v45, %v244_v42 }
  0x1d   :  { %3417 = vmatprep.subr.bf16.mxu0 %v3800_v39  ;;  %v219_v52 = vand.u32 4294901760, %v218_v46  ;;  %v239_v53 = vsub.f32 %v237_v41, %v238_v47  ;;  %v246_v54 = vsub.f32 %v244_v42, %v245_v48  ;;  %v226_v55 = vand.u32 4294901760, %v225_v49 }
  0x1e   :  { %v233_v56 = vand.u32 4294901760, %v232_v50  ;;  %v253_v57 = vsub.f32 %v251_v45, %v252_v51  ;;  %v3456_v4 = vpack.c.bf16 %v224_v43, %v217_v40  ;;  %v3460_v5 = vpack.c.bf16 %v238_v47, %v231_v44  ;;  %v2983_v50 = vld [vmem:[%s4061_s2] ss:$0 sm:$0xff] }
  0x1f   :  { %v240_v58 = vand.u32 4294901760, %v239_v53  ;;  %v247_v59 = vand.u32 4294901760, %v246_v54  ;;  %v3420_v60 = vpack.c.bf16 %v226_v55, %v219_v52  ;;  %v3464_v6 = vpack.c.bf16 %v252_v51, %v245_v48 }
  0x20   :  { %3419 = vmatpush3.bf16.msra.mxu0 %v3800_v39  ;;  %v254_v61 = vand.u32 4294901760, %v253_v57  ;;  %v699_v32 = vand.u32 4294901760, %v693_v31  ;;  %vm1253_vm9 = vcmask 1045504   ;;  %vm1218_vm12 = vcmask 113664  }
  0x21   :  { %v3424_v62 = vpack.c.bf16 %v240_v58, %v233_v56  ;;  %3421 = vmatprep.subr.bf16.mxu0 %v3420_v60  ;;  %v1254_v34 = vsel %vm1253_vm9, %v682_v30, 0 }
  0x22   :  { %v3428_v63 = vpack.c.bf16 %v254_v61, %v247_v59  ;;  %v791_v38 = vsub.f32 %v693_v31, %v699_v32 }
  0x24   :  { %v792_v42 = vand.u32 4294901760, %v791_v38 }
  0x26   :  { %v793_v44 = vsub.f32 %v791_v38, %v792_v42 }
  0x28   :  { %v794_v46 = vand.u32 4294901760, %v793_v44 }
  0x82   :  { %v86_v7 = vpop.permute.xlu0 %85 }
  0x83   :  { %v100_v8 = vsel %vm99_vm6, %v72_v28, %v86_v7  ;;  %v3822_v28 = vld [vmem:[%s4062_s3] sm:$0xff]  ;;  %v1201_v7 = vstv %s3856_s22 }
  0x84   :  { %v1257_v33 = vand.u32 4294901760, %v3822_v28 }
  0x86   :  { %v88_v9 = vpop.permute.xlu0 %87 }
  0x87   :  { %v101_v13 = vsel %vm99_vm6, %v73_v36, %v88_v9  ;;  %v1260_v36 = vand.u32 4294901760, %v1254_v34 }
  0x89   :  { %v94_v10 = vpop.permute.xlu1 %93  ;;  %v3835_v40 = vsub.f32 %v1254_v34, %v1260_v36 }
  0x8a   :  { %v103_v11 = vsel %vm102_vm7, %v100_v8, %v94_v10 }
  0x8b   :  { %v118_v12 = vsel %vm116_vm8, %v103_v11, 0 }
  0x8c   :  { %v194_v14 = vand.u32 4294901760, %v118_v12 }
  0x8d   :  { %v96_v15 = vpop.permute.xlu1 %95 }
  0x8e   :  { %v195_v16 = vsub.f32 %v118_v12, %v194_v14  ;;  %v104_v17 = vsel %vm102_vm7, %v101_v13, %v96_v15 }
  0x8f   :  { %v121_v18 = vsel %vm116_vm8, %v104_v17, 0 }
  0x90   :  { %v204_v19 = vand.u32 4294901760, %v121_v18  ;;  %v196_v20 = vand.u32 4294901760, %v195_v16 }
  0x92   :  { %v205_v21 = vsub.f32 %v121_v18, %v204_v19  ;;  %v197_v22 = vsub.f32 %v195_v16, %v196_v20 }
  0x94   :  { %v198_v23 = vand.u32 4294901760, %v197_v22  ;;  %v206_v24 = vand.u32 4294901760, %v205_v21 }
  0x96   :  { %3162 = vmatprep.mubr.f32.mxu0 %v198_v23  ;;  %v207_v25 = vsub.f32 %v205_v21, %v206_v24 }
  0x98   :  { %v208_v27 = vand.u32 4294901760, %v207_v25 }
  0x9a   :  { %3163 = vmatmul.mubr.f32.vlgmr.msra.gmra.mrb[0].mxu0 %v208_v27 }
  0x9b   :  { %3423 = vmatpush3.bf16.msra.mxu0 %v3420_v60  ;;  %3177 = vmatprep.mubr.f32.mxu0 %v194_v14 }
  0x9c   :  { %3425 = vmatprep.subr.bf16.mxu0 %v3424_v62 }
  0x9f   :  { %3427 = vmatpush3.bf16.msra.mxu0 %v3424_v62 }
  0xa0   :  { %3429 = vmatprep.subr.bf16.mxu0 %v3428_v63 }
  0xa3   :  { %3431 = vmatpush3.bf16.msra.mxu0 %v3428_v63 }
  0xa4   :  { %3433 = vmatprep.subr.bf16.mxu0 %v3432_v0 }
  0xa6   :  { %3178 = vmatmul.mubr.f32.vlgmr.msra.gmra.mrb[0].mxu0 %v204_v19 }
  0xa7   :  { %3435 = vmatpush3.bf16.msra.mxu0 %v3432_v0  ;;  %3192 = vmatprep.mubr.f32.mxu0 %v195_v16 }
  0xa8   :  { %3437 = vmatprep.subr.bf16.mxu0 %v3436_v1 }
  0xab   :  { %3439 = vmatpush3.bf16.msra.mxu0 %v3436_v1 }
  0xac   :  { %3441 = vmatprep.subr.bf16.mxu0 %v3440_v3 }
  0xaf   :  { %3443 = vmatpush3.bf16.msra.mxu0 %v3440_v3 }
  0xb0   :  { %3445 = vmatprep.subr.bf16.mxu0 %v3777_v26 }
  0xb2   :  { %3193 = vmatmul.mubr.f32.vlgmr.msra.gmra.mrb[0].mxu0 %v205_v21 }
  0xb3   :  { %3447 = vmatpush3.bf16.msra.mxu0 %v3777_v26  ;;  %3207 = vmatprep.mubr.f32.mxu0 %v196_v20 }
  0xb4   :  { %3449 = vmatprep.subr.bf16.mxu0 %v3782_v29 }
  0xb7   :  { %3451 = vmatpush3.bf16.msra.mxu0 %v3782_v29 }
  0xb8   :  { %3453 = vmatprep.subr.bf16.mxu0 %v3800_v39 }
  0xbb   :  { %3455 = vmatpush3.bf16.msra.mxu0 %v3800_v39 }
  0xbc   :  { %3457 = vmatprep.subr.bf16.mxu0 %v3456_v4 }
  0xbe   :  { %3208 = vmatmul.mubr.f32.vlgmr.msra.gmra.mrb[0].mxu0 %v206_v24 }
  0xbf   :  { %3459 = vmatpush3.bf16.msra.mxu0 %v3456_v4  ;;  %3222 = vmatprep.mubr.f32.mxu0 %v194_v14 }
  0xc0   :  { %3461 = vmatprep.subr.bf16.mxu0 %v3460_v5 }
  0xc3   :  { %3463 = vmatpush3.bf16.msra.mxu0 %v3460_v5 }
  0xc4   :  { %3465 = vmatprep.subr.bf16.mxu0 %v3464_v6 }
  0xc7   :  { %3467 = vmatpush3.bf16.msra.mxu0 %v3464_v6  ;;  %v3859_v6 = vand.u32 127, %v38_v2 }
  0xc8   :  { %3469 = vmatprep.subr.bf16.mxu0 %v3777_v26 }
  0xc9   :  { %vm1199_vm10 = vcmp.lt.s32.totalorder %v3859_v6, 12  ;;  %vm2362_vm11 = vcmp.ge.s32.totalorder %v3859_v6, 6  ;;  %vm1790_vm14 = vcmp.lt.s32.totalorder %v3859_v6, 6 }
  0xca   :  { %3223 = vmatmul.mubr.f32.vlgmr.msra.gmra.mrb[0].mxu0 %v204_v19  ;;  %vm3866_vm13 = vmand %vm2362_vm11, %vm1199_vm10 }
  0xcb   :  { %3471 = vmatpush3.bf16.msra.mxu0 %v3777_v26  ;;  %3237 = vmatprep.mubr.f32.mxu0 %v194_v14  ;;  %v690_v26 = vsel %vm102_vm7, %v3822_v28, 0 }
  0xcc   :  { %3473 = vmatprep.subr.bf16.mxu0 %v3782_v29 }
  0xcf   :  { %3475 = vmatpush3.bf16.msra.mxu0 %v3782_v29  ;;  %v696_v29 = vand.u32 4294901760, %v690_v26 }
  0xd0   :  { %3477 = vmatprep.subr.bf16.mxu0 %v3800_v39 }
  0xd1   :  { %v3480_v35 = vpack.c.bf16 %v699_v32, %v696_v29  ;;  %v784_v37 = vsub.f32 %v690_v26, %v696_v29 }
  0xd3   :  { %3479 = vmatpush3.bf16.msra.mxu0 %v3800_v39  ;;  %3481 = vmatprep.subr.bf16.mxu1 %v3480_v35  ;;  %v3833_v39 = vpack.c.bf16 %v1260_v36, %v1257_v33  ;;  %v785_v41 = vand.u32 4294901760, %v784_v37  ;;  %v3488_v48 = vpack.c.bf16 %v791_v38, %v784_v37 }
  0xd4   :  { %3483 = vmatpush3.bf16.xpose.msra.mxu1 %v3480_v35 }
  0xd5   :  { %v786_v43 = vsub.f32 %v784_v37, %v785_v41  ;;  %3529 = vmatprep.subr.bf16.mxu0 %v3833_v39  ;;  %v3496_v49 = vpack.c.bf16 %v792_v42, %v785_v41 }
  0xd6   :  { %3238 = vmatmul.mubr.f32.vlgmr.msra.gmra.mrb[0].mxu0 %v204_v19 }
  0xd7   :  { %3531 = vmatpush3.bf16.msra.mxu0 %v3833_v39  ;;  %v787_v45 = vand.u32 4294901760, %v786_v43 }
  0xd9   :  { %v3484_v47 = vpack.c.bf16 %v794_v46, %v787_v45 }
  0xdb   :  { %3485 = vmatprep.subr.bf16.mxu1 %v3484_v47 }
 0x1a9   :  { %v3239_v51 = vpop.f32.mrb[0].mxu0 }
 0x1aa   :  { %v3576_v52 = vadd.f32 %v3239_v51, %v2983_v50  ;;  %v667_v53 = vpop.f32.mrb[1].mxu0 }
 0x1ab   :  { %v3577_v54 = vadd.f32 %v2983_v50, %v667_v53 }
 0x1ac   :  { %v3842_v55 = vmax.f32 %v3576_v52, 0.0 }
 0x1ad   :  { %v3844_v56 = vmax.f32 %v3577_v54, 0.0 }
 0x1ae   :  { %v687_v57 = vsel %vm102_vm7, %v3842_v55, 0  ;;  %680 = vst.msk [vmem:[#allocation5 + $0x8] sm:$0xff] %vm102_vm7, %v3842_v55 }
 0x1af   :  { %v772_v58 = vand.u32 4294901760, %v687_v57  ;;  %679 = vst.msk [vmem:[#allocation5] sm:$0xff] %vm102_vm7, %v3844_v56  ;;  %v684_v59 = vsel %vm102_vm7, %v3844_v56, 0 }
 0x1b0   :  { %v762_v60 = vand.u32 4294901760, %v684_v59 }
 0x1b1   :  { %v773_v61 = vsub.f32 %v687_v57, %v772_v58 }
 0x1b2   :  { %v763_v62 = vsub.f32 %v684_v59, %v762_v60 }
 0x1b3   :  { %v774_v63 = vand.u32 4294901760, %v773_v61 }
 0x1b4   :  { %v764_v0 = vand.u32 4294901760, %v763_v62 }
 0x1b5   :  { %v775_v1 = vsub.f32 %v773_v61, %v774_v63 }
 0x1b6   :  { %v765_v3 = vsub.f32 %v763_v62, %v764_v0 }
 0x1b7   :  { %v776_v5 = vand.u32 4294901760, %v775_v1 }
 0x1b8   :  { %v766_v4 = vand.u32 4294901760, %v765_v3 }
 0x1ba   :  { %3244 = vmatprep.mubr.f32.mxu1 %v766_v4 }
 0x1bb   :  { %3245 = vmatmul.mubr.f32.vlgmr.msra.gmra.mrb[0].mxu1 %v776_v5 }
 0x1bc   :  { %3487 = vmatpush3.bf16.xpose.msra.mxu1 %v3484_v47  ;;  %3251 = vmatprep.mubr.f32.mxu1 %v762_v60 }
 0x1bd   :  { %3489 = vmatprep.subr.bf16.mxu1 %v3488_v48 }
 0x1c3   :  { %3252 = vmatmul.mubr.f32.vlgmr.msra.gmra.mrb[0].mxu1 %v772_v58 }
 0x1c4   :  { %3491 = vmatpush3.bf16.xpose.msra.mxu1 %v3488_v48  ;;  %3258 = vmatprep.mubr.f32.mxu1 %v763_v62  ;;  %v1353_v62 = vand.u32 4294901760, %v3835_v40 }
 0x1c5   :  { %3493 = vmatprep.subr.bf16.mxu1 %v3480_v35 }
 0x1cb   :  { %3259 = vmatmul.mubr.f32.vlgmr.msra.gmra.mrb[0].mxu1 %v773_v61 }
 0x1cc   :  { %3495 = vmatpush3.bf16.xpose.msra.mxu1 %v3480_v35  ;;  %3265 = vmatprep.mubr.f32.mxu1 %v764_v0  ;;  %v1354_v0 = vsub.f32 %v3835_v40, %v1353_v62 }
 0x1cd   :  { %3497 = vmatprep.subr.bf16.mxu1 %v3496_v49 }
 0x1ce   :  { %v1355_v4 = vand.u32 4294901760, %v1354_v0 }
 0x1d3   :  { %3266 = vmatmul.mubr.f32.vlgmr.msra.gmra.mrb[0].mxu1 %v774_v63 }
 0x1d4   :  { %3499 = vmatpush3.bf16.xpose.msra.mxu1 %v3496_v49  ;;  %3272 = vmatprep.mubr.f32.mxu1 %v762_v60 }
 0x1d5   :  { %3501 = vmatprep.subr.bf16.mxu1 %v3480_v35 }
 0x1db   :  { %3273 = vmatmul.mubr.f32.vlgmr.msra.gmra.mrb[0].mxu1 %v772_v58 }
 0x1dc   :  { %3503 = vmatpush3.bf16.xpose.msra.mxu1 %v3480_v35  ;;  %3279 = vmatprep.mubr.f32.mxu1 %v762_v60  ;;  %v1345_v60 = vsub.f32 %v3822_v28, %v1257_v33 }
 0x1dd   :  { %3505 = vmatprep.subr.bf16.mxu1 %v3833_v39 }
 0x1de   :  { %v1346_v61 = vand.u32 4294901760, %v1345_v60  ;;  %v3934_v1 = vpack.c.bf16 %v3835_v40, %v1345_v60 }
 0x1e0   :  { %v1347_v63 = vsub.f32 %v1345_v60, %v1346_v61  ;;  %v3940_v9 = vpack.c.bf16 %v1353_v62, %v1346_v61 }
 0x1e2   :  { %v1348_v3 = vand.u32 4294901760, %v1347_v63 }
 0x1e3   :  { %3280 = vmatmul.mubr.f32.vlgmr.msra.gmra.mrb[0].mxu1 %v772_v58 }
 0x1e4   :  { %3507 = vmatpush3.bf16.msra.mxu1 %v3833_v39  ;;  %v3936_v5 = vpack.c.bf16 %v1355_v4, %v1348_v3 }
 0x1e6   :  { %3509 = vmatprep.subr.bf16.mxu1 %v3936_v5  ;;  %3533 = vmatprep.subr.bf16.mxu0 %v3936_v5 }
 0x2b6   :  { %v3864_v8 = vpop.f32.mrb[0].mxu1 }
 0x2b7   :  { %v3873_v10 = vadd.f32 %v3864_v8, %v1201_v7  ;;  %v3875_v11 = vpop.f32.mrb[1].mxu1  ;;  %v1217_v2 = vsel %vm1199_vm10, %v3864_v8, -inf  ;;  %v1793_v16 = vsel %vm1790_vm14, %v3864_v8, -inf  ;;  %v2365_v21 = vsel %vm3866_vm13, %v3864_v8, -inf }
 0x2b8   :  { %v1222_v12 = vsel %vm1218_vm12, %v1217_v2, -inf  ;;  %v1216_v13 = vsel %vm1199_vm10, %v3875_v11, -inf  ;;  %v2364_v15 = vsel %vm3866_vm13, %v3875_v11, -inf  ;;  %v1797_v18 = vsel %vm1218_vm12, %v1793_v16, -inf }
 0x2b9   :  { %1223 = vmax.xlane.f32.xlu1 %v1222_v12  ;;  %v1219_v14 = vsel %vm1218_vm12, %v1216_v13, -inf  ;;  %v2366_v17 = vsel %vm1218_vm12, %v2364_v15, -inf  ;;  %v1792_v19 = vsel %vm1790_vm14, %v3875_v11, -inf  ;;  %v2369_v22 = vsel %vm1218_vm12, %v2365_v21, -inf }
 0x2ba   :  { %1220 = vmax.xlane.f32.xlu0 %v1219_v14  ;;  %v1794_v20 = vsel %vm1218_vm12, %v1792_v19, -inf }
 0x2bd   :  { %2367 = vmax.xlane.f32.xlu1 %v2366_v17 }
 0x2be   :  { %1798 = vmax.xlane.f32.xlu0 %v1797_v18 }
 0x2c2   :  { %1795 = vmax.xlane.f32.xlu0 %v1794_v20 }
 0x2c6   :  { %2370 = vmax.xlane.f32.xlu0 %v2369_v22 }
 0x346   :  { %v1224_v23 = vpop.xlane.xlu1 %1223 }
 0x347   :  { %v1226_v24 = vsub.f32 %v1217_v2, %v1224_v23  ;;  %v1221_v25 = vpop.xlane.xlu0 %1220 }
 0x348   :  { %v1225_v27 = vsub.f32 %v1216_v13, %v1221_v25 }
 0x349   :  { %v1229_v30 = vmul.f32 1.442695, %v1226_v24 }
 0x34a   :  { %v1227_v26 = vmul.f32 1.442695, %v1225_v27  ;;  %v2368_v31 = vpop.xlane.xlu1 %2367 }
 0x34b   :  { %3636 = vpow2.f32 %v1229_v30  ;;  %v1799_v29 = vpop.xlane.xlu0 %1798  ;;  %vm2372_vm0 = vcmp.eq.f32.partialorder %v2364_v15, %v2368_v31 }
 0x34c   :  { %3638 = vpow2.f32 %v1227_v26  ;;  %vm1801_vm15 = vcmp.eq.f32.partialorder %v1793_v16, %v1799_v29  ;;  %vm3903_vm2 = vmand %vm3866_vm13, %vm2372_vm0 }
 0x34d   :  { %vm1803_vm1 = vmand %vm1790_vm14, %vm1801_vm15  ;;  %v2376_v42 = vsel %vm3903_vm2, %v3859_v6, 12 }
 0x34e   :  { %v1805_v32 = vsel %vm1803_vm1, %v3859_v6, 12  ;;  %v2378_v51 = vsel %vm1218_vm12, %v2376_v42, 2147483647 }
 0x34f   :  { %v1796_v34 = vpop.xlane.xlu0 %1795  ;;  %v1821_v37 = vsel %vm1218_vm12, %v1805_v32, 2147483647  ;;  %v2380_v57 = vshra.s32 %v2378_v51, 16  ;;  %v2379_v17 = vand.u32 65535, %v2378_v51 }
 0x350   :  { %vm1800_vm3 = vcmp.eq.f32.partialorder %v1792_v19, %v1796_v34  ;;  %v1823_v44 = vshra.s32 %v1821_v37, 16  ;;  %v1822_v33 = vand.u32 65535, %v1821_v37 }
 0x351   :  { %vm1802_vm4 = vmand %vm1790_vm14, %vm1800_vm3  ;;  %v2382_v59 = vcvt.s32.f32 %v2380_v57  ;;  %v2381_v23 = vcvt.s32.f32 %v2379_v17 }
 0x352   :  { %v1804_v36 = vsel %vm1802_vm4, %v3859_v6, 12  ;;  %v1825_v52 = vcvt.s32.f32 %v1823_v44  ;;  %v1824_v40 = vcvt.s32.f32 %v1822_v33 }
 0x353   :  { %v2371_v38 = vpop.xlane.xlu0 %2370  ;;  %v1806_v41 = vsel %vm1218_vm12, %v1804_v36, 2147483647 }
 0x354   :  { %vm2373_vm5 = vcmp.eq.f32.partialorder %v2365_v21, %v2371_v38  ;;  %v1808_v48 = vshra.s32 %v1806_v41, 16  ;;  %v1807_v12 = vand.u32 65535, %v1806_v41 }
 0x355   :  { %v3915_v43 = vpop.eup %3636  ;;  %vm2375_vm6 = vmand %vm3866_vm13, %vm2373_vm5 }
 0x356   :  { %v3919_v45 = vpop.eup %3638  ;;  %v2377_v46 = vsel %vm2375_vm6, %v3859_v6, 12  ;;  %v1234_v47 = vsel %vm1218_vm12, %v3915_v43, 0.0  ;;  %v1810_v54 = vcvt.s32.f32 %v1808_v48  ;;  %v1809_v16 = vcvt.s32.f32 %v1807_v12 }
 0x357   :  { %1235 = vadd.xlane.f32.xlu0 %v1234_v47  ;;  %v1231_v49 = vsel %vm1218_vm12, %v3919_v45, 0.0  ;;  %v2393_v50 = vsel %vm1218_vm12, %v2377_v46, 2147483647 }
 0x358   :  { %1232 = vadd.xlane.f32.xlu1 %v1231_v49  ;;  %v2395_v53 = vshra.s32 %v2393_v50, 16  ;;  %v2394_v14 = vand.u32 65535, %v2393_v50 }
 0x35a   :  { %v2397_v58 = vcvt.s32.f32 %v2395_v53  ;;  %v2396_v21 = vcvt.s32.f32 %v2394_v14 }
 0x35b   :  { %1826 = vmin.xlane.f32.xlu0 %v1825_v52 }
 0x35c   :  { %1811 = vmin.xlane.f32.xlu1 %v1810_v54 }
 0x35f   :  { %2398 = vmin.xlane.f32.xlu0 %v2397_v58 }
 0x360   :  { %2383 = vmin.xlane.f32.xlu1 %v2382_v59 }
 0x3e4   :  { %v1236_v28 = vpop.xlane.xlu0 %1235 }
 0x3e5   :  { %3640 = vrcp.f32 %v1236_v28  ;;  %v1233_v2 = vpop.xlane.xlu1 %1232 }
 0x3e6   :  { %3642 = vrcp.f32 %v1233_v2 }
 0x3e8   :  { %v3942_v13 = vpop.xlane.xlu0 %1826 }
 0x3e9   :  { %v3944_v15 = vpop.xlane.xlu1 %1811  ;;  %vm1828_vm8 = vcmp.eq.f32.partialorder %v1825_v52, %v3942_v13 }
 0x3ea   :  { %v1829_v18 = vsel %vm1828_vm8, %v1824_v40, inf  ;;  %vm1813_vm9 = vcmp.eq.f32.partialorder %v1810_v54, %v3944_v15 }
 0x3eb   :  { %1830 = vmin.xlane.f32.xlu0 %v1829_v18  ;;  %v1814_v19 = vsel %vm1813_vm9, %v1809_v16, inf }
 0x3ec   :  { %1815 = vmin.xlane.f32.xlu1 %v1814_v19  ;;  %v3948_v20 = vpop.xlane.xlu0 %2398 }
 0x3ed   :  { %v3950_v22 = vpop.xlane.xlu1 %2383  ;;  %vm2400_vm10 = vcmp.eq.f32.partialorder %v2397_v58, %v3948_v20  ;;  %v2405_v58 = vcvt.f32.s32 %v3948_v20 }
 0x3ee   :  { %v2401_v24 = vsel %vm2400_vm10, %v2396_v21, inf  ;;  %vm2385_vm11 = vcmp.eq.f32.partialorder %v2382_v59, %v3950_v22  ;;  %v2390_v62 = vcvt.f32.s32 %v3950_v22 }
 0x3ef   :  { %v3641_v25 = vpop.eup %3640  ;;  %2402 = vmin.xlane.f32.xlu0 %v2401_v24  ;;  %v2386_v27 = vsel %vm2385_vm11, %v2381_v23, inf }
 0x3f0   :  { %v3643_v30 = vpop.eup %3642  ;;  %v1240_v26 = vmul.f32 %v3641_v25, %v1236_v28  ;;  %2387 = vmin.xlane.f32.xlu1 %v2386_v27  ;;  %v2406_v28 = vshll.u32 %v2405_v58, 16  ;;  %v2391_v12 = vshll.u32 %v2390_v62, 16 }
 0x3f1   :  { %v1239_v31 = vmul.f32 %v3643_v30, %v1233_v2 }
 0x3f2   :  { %v1242_v29 = vsub.f32 2.0, %v1240_v26 }
 0x3f3   :  { %v1241_v32 = vsub.f32 2.0, %v1239_v31 }
 0x3f4   :  { %v1244_v34 = vmul.f32 %v3641_v25, %v1242_v29 }
 0x3f5   :  { %v1243_v35 = vmul.f32 %v3643_v30, %v1241_v32 }
 0x3f6   :  { %v1246_v36 = vmul.f32 %v3915_v43, %v1244_v34  ;;  %v1833_v43 = vcvt.f32.s32 %v3942_v13  ;;  %v3701_v13 = vmov 0.0  }
 0x3f7   :  { %v1245_v37 = vmul.f32 %v3919_v45, %v1243_v35  ;;  %v1818_v45 = vcvt.f32.s32 %v3944_v15 }
 0x3f8   :  { %v1251_v38 = vsel %vm1218_vm12, %v1246_v36, 0  ;;  %v1834_v57 = vshll.u32 %v1833_v43, 16 }
 0x3f9   :  { %v1333_v41 = vand.u32 4294901760, %v1251_v38  ;;  %v1248_v42 = vsel %vm1218_vm12, %v1245_v37, 0  ;;  %v1819_v61 = vshll.u32 %v1818_v45, 16 }
 0x3fa   :  { %v1323_v44 = vand.u32 4294901760, %v1248_v42 }
 0x3fb   :  { %v1334_v46 = vsub.f32 %v1251_v38, %v1333_v41 }
 0x3fc   :  { %v1324_v47 = vsub.f32 %v1248_v42, %v1323_v44 }
 0x3fd   :  { %v1335_v48 = vand.u32 4294901760, %v1334_v46 }
 0x3fe   :  { %v1325_v49 = vand.u32 4294901760, %v1324_v47 }
 0x3ff   :  { %v1336_v50 = vsub.f32 %v1334_v46, %v1335_v48 }
 0x400   :  { %v1326_v51 = vsub.f32 %v1324_v47, %v1325_v49 }
 0x401   :  { %v1337_v53 = vand.u32 4294901760, %v1336_v50 }
 0x402   :  { %v1327_v52 = vand.u32 4294901760, %v1326_v51 }
 0x404   :  { %3286 = vmatprep.mubr.f32.mxu1 %v1327_v52  ;;  %v2985_v52 = vmul.f32 -1.442695, %v3873_v10 }
 0x405   :  { %3287 = vmatmul.mubr.f32.vlgmr.msra.gmra.mrb[2].mxu1 %v1337_v53 }
 0x406   :  { %3511 = vmatpush3.bf16.msra.mxu1 %v3936_v5  ;;  %3293 = vmatprep.mubr.f32.mxu1 %v1323_v44 }
 0x407   :  { %3513 = vmatprep.subr.bf16.mxu1 %v3934_v1 }
 0x40d   :  { %3294 = vmatmul.mubr.f32.vlgmr.msra.gmra.mrb[2].mxu1 %v1333_v41 }
 0x40e   :  { %3515 = vmatpush3.bf16.msra.mxu1 %v3934_v1  ;;  %3300 = vmatprep.mubr.f32.mxu1 %v1324_v47 }
 0x40f   :  { %3517 = vmatprep.subr.bf16.mxu1 %v3833_v39 }
 0x415   :  { %3301 = vmatmul.mubr.f32.vlgmr.msra.gmra.mrb[2].mxu1 %v1334_v46 }
 0x416   :  { %3519 = vmatpush3.bf16.msra.mxu1 %v3833_v39  ;;  %3307 = vmatprep.mubr.f32.mxu1 %v1325_v49 }
 0x417   :  { %3521 = vmatprep.subr.bf16.mxu1 %v3940_v9 }
 0x41d   :  { %3308 = vmatmul.mubr.f32.vlgmr.msra.gmra.mrb[2].mxu1 %v1335_v48 }
 0x41e   :  { %3523 = vmatpush3.bf16.msra.mxu1 %v3940_v9  ;;  %3314 = vmatprep.mubr.f32.mxu1 %v1323_v44 }
 0x41f   :  { %3525 = vmatprep.subr.bf16.mxu1 %v3833_v39 }
 0x425   :  { %3315 = vmatmul.mubr.f32.vlgmr.msra.gmra.mrb[2].mxu1 %v1333_v41 }
 0x426   :  { %3527 = vmatpush3.bf16.msra.mxu1 %v3833_v39  ;;  %3321 = vmatprep.mubr.f32.mxu1 %v1323_v44 }
 0x427   :  { %3553 = vmatprep.subr.bf16.mxu1 %v3833_v39 }
 0x42d   :  { %3322 = vmatmul.mubr.f32.vlgmr.msra.gmra.mrb[2].mxu1 %v1333_v41 }
 0x42e   :  { %3555 = vmatpush3.bf16.msra.mxu1 %v3833_v39 }
 0x42f   :  { %3557 = vmatprep.subr.bf16.mxu1 %v3936_v5 }
 0x478   :  { %v1831_v54 = vpop.xlane.xlu0 %1830 }
 0x479   :  { %v1832_v59 = vcvt.f32.s32 %v1831_v54  ;;  %v1816_v60 = vpop.xlane.xlu1 %1815 }
 0x47a   :  { %v1817_v63 = vcvt.f32.s32 %v1816_v60 }
 0x47b   :  { %v1835_v0 = vadd.s32 %v1834_v57, %v1832_v59 }
 0x47c   :  { %v1820_v3 = vadd.s32 %v1819_v61, %v1817_v63  ;;  %v2403_v4 = vpop.xlane.xlu0 %2402 }
 0x47d   :  { %vm1837_vm13 = vcmp.eq.s32.totalorder %v3859_v6, %v1835_v0  ;;  %v2404_v33 = vcvt.f32.s32 %v2403_v4  ;;  %v2388_v2 = vpop.xlane.xlu1 %2387 }
 0x47e   :  { %v3975_v40 = vsel %vm1837_vm13, 1.0, %v3701_v13  ;;  %vm1836_vm14 = vcmp.eq.s32.totalorder %v3859_v6, %v1820_v3  ;;  %v2389_v14 = vcvt.f32.s32 %v2388_v2 }
 0x47f   :  { %v1846_v15 = vsel %vm1218_vm12, %v3975_v40, 0  ;;  %v2990_v16 = vsel %vm1836_vm14, 1.0, %v3701_v13  ;;  %v2407_v17 = vadd.s32 %v2406_v28, %v2404_v33 }
 0x480   :  { %v1926_v18 = vsub.f32 %v1846_v15, %v1846_v15  ;;  %v2392_v19 = vadd.s32 %v2391_v12, %v2389_v14  ;;  %v1843_v20 = vsel %vm1218_vm12, %v2990_v16, 0 }
 0x481   :  { %vm2409_vm15 = vcmp.eq.s32.totalorder %v3859_v6, %v2407_v17  ;;  %v1916_v21 = vsub.f32 %v1843_v20, %v1843_v20 }
 0x482   :  { %v2999_v22 = vsel %vm2409_vm15, 1.0, %v3701_v13  ;;  %vm2408_vm0 = vcmp.eq.s32.totalorder %v3859_v6, %v2392_v19  ;;  %v1927_v23 = vand.u32 4294901760, %v1926_v18 }
 0x483   :  { %v2418_v24 = vsel %vm1218_vm12, %v2999_v22, 0  ;;  %v2998_v25 = vsel %vm2408_vm0, 1.0, %v3701_v13  ;;  %v1917_v27 = vand.u32 4294901760, %v1916_v21 }
 0x484   :  { %v2498_v30 = vsub.f32 %v2418_v24, %v2418_v24  ;;  %v1928_v26 = vsub.f32 %v1926_v18, %v1927_v23  ;;  %v2415_v31 = vsel %vm1218_vm12, %v2998_v25, 0 }
 0x485   :  { %v1918_v29 = vsub.f32 %v1916_v21, %v1917_v27  ;;  %v2488_v32 = vsub.f32 %v2415_v31, %v2415_v31 }
 0x486   :  { %v2499_v34 = vand.u32 4294901760, %v2498_v30  ;;  %v1929_v37 = vand.u32 4294901760, %v1928_v26 }
 0x487   :  { %v1919_v35 = vand.u32 4294901760, %v1918_v29  ;;  %v2489_v36 = vand.u32 4294901760, %v2488_v32 }
 0x488   :  { %v2500_v38 = vsub.f32 %v2498_v30, %v2499_v34 }
 0x489   :  { %3328 = vmatprep.mubr.f32.mxu0 %v1919_v35  ;;  %v2490_v41 = vsub.f32 %v2488_v32, %v2489_v36 }
 0x48a   :  { %3329 = vmatmul.mubr.f32.vlgmr.msra.gmra.mrb[2].mxu0 %v1929_v37  ;;  %v2501_v42 = vand.u32 4294901760, %v2500_v38 }
 0x48b   :  { %3335 = vmatprep.mubr.msk.f32.mxu0 %vm1218_vm12, %v2990_v16  ;;  %3535 = vmatpush3.bf16.msra.mxu0 %v3936_v5  ;;  %v2491_v6 = vand.u32 4294901760, %v2490_v41 }
 0x48c   :  { %3537 = vmatprep.subr.bf16.mxu0 %v3934_v1 }
 0x48d   :  { %3370 = vmatprep.mubr.f32.mxu1 %v2491_v6 }
 0x48e   :  { %3371 = vmatmul.mubr.f32.vlgmr.msra.gmra.mrb[4].mxu1 %v2501_v42 }
 0x48f   :  { %3377 = vmatprep.mubr.msk.f32.mxu1 %vm1218_vm12, %v2998_v25  ;;  %3559 = vmatpush3.bf16.msra.mxu1 %v3936_v5 }
 0x490   :  { %3561 = vmatprep.subr.bf16.mxu1 %v3934_v1 }
 0x492   :  { %3336 = vmatmul.mubr.msk.f32.vlgmr.msra.gmra.mrb[2].mxu0 %vm1218_vm12, %v3975_v40 }
 0x493   :  { %3342 = vmatprep.mubr.f32.mxu0 %v1916_v21  ;;  %3539 = vmatpush3.bf16.msra.mxu0 %v3934_v1 }
 0x494   :  { %3541 = vmatprep.subr.bf16.mxu0 %v3833_v39 }
 0x496   :  { %3378 = vmatmul.mubr.msk.f32.vlgmr.msra.gmra.mrb[4].mxu1 %vm1218_vm12, %v2999_v22 }
 0x497   :  { %3384 = vmatprep.mubr.f32.mxu1 %v2488_v32  ;;  %3563 = vmatpush3.bf16.msra.mxu1 %v3934_v1  ;;  %v1202_v1 = vadd.f32 %v1201_v7, %v3875_v11 }
 0x498   :  { %3565 = vmatprep.subr.bf16.mxu1 %v3833_v39 }
 0x499   :  { %v2984_v5 = vmul.f32 -1.442695, %v1202_v1 }
 0x49a   :  { %3343 = vmatmul.mubr.f32.vlgmr.msra.gmra.mrb[2].mxu0 %v1926_v18 }
 0x49b   :  { %3349 = vmatprep.mubr.f32.mxu0 %v1917_v27  ;;  %3543 = vmatpush3.bf16.msra.mxu0 %v3833_v39  ;;  %3644 = vpow2.f32 %v2984_v5 }
 0x49c   :  { %3545 = vmatprep.subr.bf16.mxu0 %v3940_v9 }
 0x49e   :  { %3385 = vmatmul.mubr.f32.vlgmr.msra.gmra.mrb[4].mxu1 %v2498_v30 }
 0x49f   :  { %3391 = vmatprep.mubr.f32.mxu1 %v2489_v36  ;;  %3567 = vmatpush3.bf16.msra.mxu1 %v3833_v39 }
 0x4a0   :  { %3569 = vmatprep.subr.bf16.mxu1 %v3940_v9 }
 0x4a2   :  { %3350 = vmatmul.mubr.f32.vlgmr.msra.gmra.mrb[2].mxu0 %v1927_v23 }
 0x4a3   :  { %3356 = vmatprep.mubr.msk.f32.mxu0 %vm1218_vm12, %v2990_v16  ;;  %3547 = vmatpush3.bf16.msra.mxu0 %v3940_v9 }
 0x4a4   :  { %3549 = vmatprep.subr.bf16.mxu0 %v3833_v39 }
 0x4a5   :  { %v3645_v49 = vpop.eup %3644 }
 0x4a6   :  { %3392 = vmatmul.mubr.f32.vlgmr.msra.gmra.mrb[4].mxu1 %v2499_v34  ;;  %v1210_v51 = vadd.f32 1.0, %v3645_v49 }
 0x4a7   :  { %3398 = vmatprep.mubr.msk.f32.mxu1 %vm1218_vm12, %v2998_v25  ;;  %3571 = vmatpush3.bf16.msra.mxu1 %v3940_v9  ;;  %v2986_v9 = vld [vmem:[%s4061_s2 + $0x1] ss:$0 sm:$0xff]  ;;  %s2987_s2 = sld [smem:[#allocation2 + $0x1]] }
 0x4a8   :  { %3573 = vmatprep.subr.bf16.mxu1 %v3833_v39  ;;  %3646 = vrcp.f32 %v1210_v51 }
 0x4a9   :  { %3648 = vpow2.f32 %v2985_v52 }
 0x4aa   :  { %3357 = vmatmul.mubr.msk.f32.vlgmr.msra.gmra.mrb[2].mxu0 %vm1218_vm12, %v3975_v40 }
 0x4ab   :  { %3363 = vmatprep.mubr.msk.f32.mxu0 %vm1218_vm12, %v2990_v16  ;;  %3551 = vmatpush3.bf16.msra.mxu0 %v3833_v39 }
 0x4ad   :  { %v1774_v33 = vstv %s2987_s2 }
 0x4ae   :  { %3399 = vmatmul.mubr.msk.f32.vlgmr.msra.gmra.mrb[4].mxu1 %vm1218_vm12, %v2999_v22 }
 0x4af   :  { %3405 = vmatprep.mubr.msk.f32.mxu1 %vm1218_vm12, %v2998_v25  ;;  %3575 = vmatpush3.bf16.msra.mxu1 %v3833_v39 }
 0x4b2   :  { %3364 = vmatmul.mubr.msk.f32.vlgmr.msra.gmra.mrb[2].mxu0 %vm1218_vm12, %v3975_v40  ;;  %v3647_v7 = vpop.eup %3646 }
 0x4b3   :  { %v3649_v13 = vpop.eup %3648 }
 0x4b4   :  { %v1211_v15 = vadd.f32 1.0, %v3649_v13 }
 0x4b6   :  { %3406 = vmatmul.mubr.msk.f32.vlgmr.msra.gmra.mrb[4].mxu1 %vm1218_vm12, %v2999_v22 }
 0x500   :  { %v3323_v44 = vpop.f32.mrb[2].mxu1 }
 0x501   :  { %v1764_v46 = vmul.f32 %v3323_v44, %v2986_v9  ;;  %v1748_v47 = vpop.f32.mrb[3].mxu1 }
 0x502   :  { %v1763_v48 = vmul.f32 %v2986_v9, %v1748_v47 }
 0x503   :  { %v1768_v39 = vsel %vm102_vm7, %v1764_v46, 0.0 }
 0x504   :  { %1769 = vadd.xlane.f32.xlu0 %v1768_v39  ;;  %v1765_v50 = vsel %vm102_vm7, %v1763_v48, 0.0 }
 0x505   :  { %1766 = vadd.xlane.f32.xlu1 %v1765_v50 }
 0x516   :  { %2936 = vrot.lane.b32.xlu1 %v3647_v7, %s3702_s25 }
 0x585   :  { %v3365_v53 = vpop.f32.mrb[2].mxu0 }
 0x586   :  { %v2351_v43 = vsub.f32 %v3842_v55, %v3365_v53  ;;  %v2340_v45 = vpop.f32.mrb[3].mxu0 }
 0x587   :  { %v2350_v54 = vsub.f32 %v3844_v56, %v2340_v45 }
 0x588   :  { %v2353_v57 = vmul.f32 %v2351_v43, %v2351_v43 }
 0x589   :  { %v2352_v58 = vmul.f32 %v2350_v54, %v2350_v54  ;;  %v3407_v59 = vpop.f32.mrb[4].mxu1 }
 0x58a   :  { %v2923_v60 = vsub.f32 %v3842_v55, %v3407_v59  ;;  %v2912_v61 = vpop.f32.mrb[5].mxu1  ;;  %v2357_v62 = vsel %vm102_vm7, %v2353_v57, 0.0 }
 0x58b   :  { %v2922_v63 = vsub.f32 %v3844_v56, %v2912_v61  ;;  %2358 = vadd.xlane.f32.xlu0 %v2357_v62  ;;  %v2354_v10 = vsel %vm102_vm7, %v2352_v58, 0.0 }
 0x58c   :  { %v2925_v0 = vmul.f32 %v2923_v60, %v2923_v60  ;;  %2355 = vadd.xlane.f32.xlu1 %v2354_v10 }
 0x58d   :  { %v2924_v3 = vmul.f32 %v2922_v63, %v2922_v63 }
 0x58e   :  { %v2929_v4 = vsel %vm102_vm7, %v2925_v0, 0.0 }
 0x58f   :  { %2930 = vadd.xlane.f32.xlu0 %v2929_v4  ;;  %v2926_v28 = vsel %vm102_vm7, %v2924_v3, 0.0 }
 0x590   :  { %2927 = vadd.xlane.f32.xlu1 %v2926_v28 }
 0x591   :  { %v1770_v2 = vpop.xlane.xlu0 %1769 }
 0x592   :  { %v1772_v55 = vadd.f32 %v3864_v8, %v1770_v2  ;;  %v1767_v12 = vpop.xlane.xlu1 %1766 }
 0x593   :  { %v1771_v56 = vadd.f32 %v1767_v12, %v3875_v11 }
 0x594   :  { %v1776_v40 = vadd.f32 %v1774_v33, %v1772_v55 }
 0x595   :  { %v1775_v14 = vadd.f32 %v1774_v33, %v1771_v56 }
 0x596   :  { %v2989_v16 = vmul.f32 -1.442695, %v1776_v40 }
 0x597   :  { %v2988_v17 = vmul.f32 -1.442695, %v1775_v14 }
 0x598   :  { %3650 = vpow2.f32 %v2989_v16 }
 0x599   :  { %3652 = vpow2.f32 %v2988_v17 }
 0x59a   :  { %3654 = vrcp.f32 %v1211_v15 }
 0x5a2   :  { %v3651_v18 = vpop.eup %3650 }
 0x5a3   :  { %v3653_v19 = vpop.eup %3652  ;;  %v1784_v22 = vadd.f32 1.0, %v3651_v18 }
 0x5a4   :  { %v3655_v20 = vpop.eup %3654  ;;  %v1783_v21 = vadd.f32 1.0, %v3653_v19 }
 0x5a5   :  { %2938 = vrot.lane.b32.xlu0 %v3655_v20, %s3702_s25 }
 0x5a6   :  { %3656 = vrcp.f32 %v1783_v21 }
 0x5a7   :  { %3658 = vrcp.f32 %v1784_v22 }
 0x5a8   :  { %3683 = shalt.err (!%p3680_p9)
}
 0x5a9   :  { %s3684_s30 = scalar_lea.hbm %s4064_s5, 256 }
 0x5aa   :  { %p3685_p10 = scmp.ne.s32.totalorder %s4064_s5, %s3684_s30  ;;  %p3688_p11 = scmp.lt.u32.totalorder %s3684_s30, %s4064_s5 }
 0x5ac   :  { %p3690_p12 = pnand %p3688_p11, %p3685_p10 }
 0x5ae   :  { %3693 = shalt.err (!%p3690_p12)
}
 0x5af   :  { %s3704_s0 = smov 128   ;;  %s3705_s11 = smov 8   ;;  %v2937_v23 = vpop.permute.xlu1 %2936  ;;  %vm2950_vm7 = vcmask 7168   ;;  %vm2953_vm12 = vcmask 15360   ;;  %vm2956_vm1 = vcmask 23552   ;;  %vm2959_vm2 = vcmask 31744  }
 0x5b0   :  { %2973 = dma.vmem_to_hbm [thread:$0]  %s2968_s27, 256, %s4064_s5, [#allocation3], %s3704_s0, %s3704_s0, %s3705_s11   ;;  %v3657_v8 = vpop.eup %3656 }
 0x5b1   :  { %2944 = vrot.lane.b32.xlu1 %v3657_v8, %s3702_s25  ;;  %v3659_v11 = vpop.eup %3658 }
 0x5b5   :  { %2946 = vrot.lane.b32.xlu1 %v3659_v11, %s3702_s25 }
 0x618   :  { %v2359_v25 = vpop.xlane.xlu0 %2358 }
 0x619   :  { %v2356_v24 = vpop.xlane.xlu1 %2355  ;;  %v2361_v36 = vmul.f32 0.03125, %v2359_v25 }
 0x61a   :  { %v2360_v26 = vmul.f32 0.03125, %v2356_v24 }
 0x61c   :  { %v2931_v30 = vpop.xlane.xlu0 %2930 }
 0x61d   :  { %v2928_v27 = vpop.xlane.xlu1 %2927  ;;  %v2933_v41 = vmul.f32 0.03125, %v2931_v30 }
 0x61e   :  { %v2932_v29 = vmul.f32 0.03125, %v2928_v27 }
 0x620   :  { %v2939_v37 = vpop.permute.xlu0 %2938 }
 0x623   :  { %v2945_v31 = vpop.permute.xlu1 %2944 }
 0x624   :  { %v2951_v32 = vsel %vm2950_vm7, %v2937_v23, %v2945_v31 }
 0x625   :  { %v2954_v34 = vsel %vm2953_vm12, %v2951_v32, %v2360_v26 }
 0x626   :  { %v2957_v35 = vsel %vm2956_vm1, %v2954_v34, %v2932_v29 }
 0x627   :  { %2960 = vst.msk [vmem:[%s4065_s6] sm:$0xff] %vm2959_vm2, %v2957_v35  ;;  %v2947_v38 = vpop.permute.xlu1 %2946 }
 0x628   :  { %v2952_v6 = vsel %vm2950_vm7, %v2939_v37, %v2947_v38 }
 0x629   :  { %v2955_v42 = vsel %vm2953_vm12, %v2952_v6, %v2361_v36 }
 0x62a   :  { %v2958_v1 = vsel %vm2956_vm1, %v2955_v42, %v2933_v41 }
 0x62b   :  { %2961 = vst.msk [vmem:[%s4065_s6 + $0x8] sm:$0xff] %vm2959_vm2, %v2958_v1 }
 0x62c   :  { %3696 = dma.done.wait [#allocation3], 256  }
 0x62d   :  { %3697 = vsyncadd [#allocation3], 4294967040 }
 0x62e   :  { %2981 = vsyncpa [#allocation3], 1 }
 0x62f   :  { %2982 = vsyncpa [#allocation4], 1 }

</bundles_post_ra>
